<compile_context>
chip_gen: v7x
topology: tpu7x:2x2x1
jax: 0.10.0
libtpu: 0.0.40
codegen_flags: <defaults>
</compile_context>

<pallas_src>
import jax
import jax.numpy as jnp
from jax.experimental import pallas as pl
from jax.experimental.pallas import tpu as pltpu

BN_EPS = 1e-5
_STREAM_VMEM_LIMIT = 32 * 1024 * 1024   # safe on v5e/v6e/v7x
_FUSED_VMEM_LIMIT = 48 * 1024 * 1024    # < v7x's 64 MiB physical VMEM


def _round_up(a, b):
    return (a + b - 1) // b * b


# ---------------------------------------------------------------------------
# Fused single-call kernel (whole batch resident in VMEM)
# ---------------------------------------------------------------------------
def _make_fused_kernel(n_real, n_cols):
    inv_n = 1.0 / float(n_real)
    need_mask = n_cols != n_real

    def kernel(xT_ref, w1T_ref, w2T_ref, w3T_ref,
               g1_ref, b1_ref, g2_ref, b2_ref, g3_ref, b3_ref, out_ref):
        if need_mask:
            col = jax.lax.broadcasted_iota(jnp.int32, (1, n_cols), 1)
            mask = (col < n_real).astype(jnp.float32)

        def bn_coeffs(h, g, b):
            # Padded columns of h are exactly zero (zero-padded input, masked
            # activations, no biases), so summing over all lanes is exact.
            mean = jnp.sum(h, axis=1, keepdims=True) * inv_n
            msq = jnp.sum(h * h, axis=1, keepdims=True) * inv_n
            var = jnp.maximum(msq - mean * mean, 0.0)
            scale = g * jax.lax.rsqrt(var + BN_EPS)
            shift = b - mean * scale
            return scale, shift

        # ---- Lin1 + BN1 + ReLU ----
        a = xT_ref[...]                                             # (f0, N)
        h = jnp.dot(w1T_ref[...], a, preferred_element_type=jnp.float32)
        scale, shift = bn_coeffs(h, g1_ref[...], b1_ref[...])
        a = jnp.maximum(h * scale + shift, 0.0)
        if need_mask:
            a = a * mask
        # ---- Lin2 + BN2 + ReLU ----
        h = jnp.dot(w2T_ref[...], a, preferred_element_type=jnp.float32)
        scale, shift = bn_coeffs(h, g2_ref[...], b2_ref[...])
        a = jnp.maximum(h * scale + shift, 0.0)
        if need_mask:
            a = a * mask
        # ---- Lin3 + BN3 ----
        h = jnp.dot(w3T_ref[...], a, preferred_element_type=jnp.float32)
        scale, shift = bn_coeffs(h, g3_ref[...], b3_ref[...])
        out_ref[...] = h * scale + shift

    return kernel


# ---------------------------------------------------------------------------
# Streaming-path kernels ((F, N) layout, resident stat accumulators)
# ---------------------------------------------------------------------------
def _make_stage_kernel(normalize_input):
    def kernel(*refs):
        if normalize_input:
            a_ref, scale_ref, shift_ref, wT_ref, h_ref, sum_ref, sq_ref = refs
        else:
            a_ref, wT_ref, h_ref, sum_ref, sq_ref = refs
        i = pl.program_id(0)

        a = a_ref[...].astype(jnp.float32)      # upconvert (v5e has no bf16 VPU)
        if normalize_input:
            # Previous stage's BatchNorm fused into one scale/shift FMA + ReLU.
            a = jnp.maximum(a * scale_ref[...] + shift_ref[...], 0.0)

        # Linear bias intentionally omitted (cancelled by train-mode BN).
        h = jnp.dot(wT_ref[...], a, preferred_element_type=jnp.float32)
        h_ref[...] = h.astype(h_ref.dtype)

        @pl.when(i == 0)
        def _init():
            sum_ref[...] = jnp.zeros_like(sum_ref)
            sq_ref[...] = jnp.zeros_like(sq_ref)

        sum_ref[...] += jnp.sum(h, axis=1, keepdims=True)
        sq_ref[...] += jnp.sum(h * h, axis=1, keepdims=True)

    return kernel


def _finalize_kernel(h_ref, scale_ref, shift_ref, o_ref):
    h = h_ref[...].astype(jnp.float32)
    o_ref[...] = h * scale_ref[...] + shift_ref[...]


def _run_stream_stage(hT, wT, scale, shift, *, grid, n_blk, interm_dtype):
    f_o, f_i = wT.shape
    n_pad = hT.shape[1]
    normalize = scale is not None

    in_specs = [pl.BlockSpec((f_i, n_blk), lambda i: (0, i))]
    args = [hT]
    if normalize:
        in_specs += [pl.BlockSpec((f_i, 1), lambda i: (0, 0)),
                     pl.BlockSpec((f_i, 1), lambda i: (0, 0))]
        args += [scale, shift]
    in_specs.append(pl.BlockSpec((f_o, f_i), lambda i: (0, 0)))
    args.append(wT)

    out_shape = (jax.ShapeDtypeStruct((f_o, n_pad), interm_dtype),
                 jax.ShapeDtypeStruct((f_o, 1), jnp.float32),
                 jax.ShapeDtypeStruct((f_o, 1), jnp.float32))
    out_specs = (pl.BlockSpec((f_o, n_blk), lambda i: (0, i)),
                 pl.BlockSpec((f_o, 1), lambda i: (0, 0)),   # sum   (resident)
                 pl.BlockSpec((f_o, 1), lambda i: (0, 0)))   # sumsq (resident)

    return pl.pallas_call(
        _make_stage_kernel(normalize),
        grid=(grid,),
        in_specs=in_specs,
        out_specs=out_specs,
        out_shape=out_shape,
        compiler_params=pltpu.CompilerParams(
            dimension_semantics=("arbitrary",),   # stats accumulate over N
            vmem_limit_bytes=_STREAM_VMEM_LIMIT),
    )(*args)


# ---------------------------------------------------------------------------
# Wrapper
# ---------------------------------------------------------------------------
def _bn_scale_shift(col_sum, col_sq, gamma, beta, n):
    """(F,1) fused-BN coefficients from per-feature sum / sum-of-squares."""
    mean = col_sum / n
    # TODO(synk): shifted / Welford accumulation if activations drift far from 0
    var = jnp.maximum(col_sq / n - mean * mean, 0.0)
    scale = gamma * jax.lax.rsqrt(var + BN_EPS)
    shift = beta - mean * scale
    return scale, shift


def nn_forward(x, params, *, n_block_max=4096,
               intermediate_dtype=jnp.float32,
               max_fused_bytes=24 * 1024 * 1024):
    """x: (N, edge_feat_num) float32.  Returns (N, dim*dim) float32."""
    n_real, f0 = x.shape
    w1T, w2T, w3T = params["w1"].T, params["w2"].T, params["w3"].T
    f1, f2, f3 = w1T.shape[0], w2T.shape[0], w3T.shape[0]
    g1, be1 = params["g1"].reshape(f1, 1), params["be1"].reshape(f1, 1)
    g2, be2 = params["g2"].reshape(f2, 1), params["be2"].reshape(f2, 1)
    g3, be3 = params["g3"].reshape(f3, 1), params["be3"].reshape(f3, 1)

    def pad_t(xx, n_to):
        xT = xx.T
        if n_to != xT.shape[1]:
            xT = jnp.pad(xT, ((0, 0), (0, n_to - xT.shape[1])))  # zero cols
        return xT

    # ------------------ fused single-pallas_call fast path ------------------
    n_cols = _round_up(max(n_real, 1), 128)
    est_bytes = 4 * n_cols * (f0 + 3 * f1 + 3 * f2 + 2 * f3)   # conservative
    if est_bytes <= max_fused_bytes:
        xT = pad_t(x, n_cols)
        out = pl.pallas_call(
            _make_fused_kernel(n_real, n_cols),
            grid=(1,),
            in_specs=[pl.BlockSpec((f0, n_cols), lambda i: (0, 0)),
                      pl.BlockSpec((f1, f0), lambda i: (0, 0)),
                      pl.BlockSpec((f2, f1), lambda i: (0, 0)),
                      pl.BlockSpec((f3, f2), lambda i: (0, 0)),
                      pl.BlockSpec((f1, 1), lambda i: (0, 0)),
                      pl.BlockSpec((f1, 1), lambda i: (0, 0)),
                      pl.BlockSpec((f2, 1), lambda i: (0, 0)),
                      pl.BlockSpec((f2, 1), lambda i: (0, 0)),
                      pl.BlockSpec((f3, 1), lambda i: (0, 0)),
                      pl.BlockSpec((f3, 1), lambda i: (0, 0))],
            out_specs=pl.BlockSpec((f3, n_cols), lambda i: (0, 0)),
            out_shape=jax.ShapeDtypeStruct((f3, n_cols), jnp.float32),
            compiler_params=pltpu.CompilerParams(
                dimension_semantics=("arbitrary",),
                vmem_limit_bytes=_FUSED_VMEM_LIMIT),
        )(xT, w1T, w2T, w3T, g1, be1, g2, be2, g3, be3)
        return out[:, :n_real].T

    # --------------------- streaming fallback path --------------------------
    n_blk = min(_round_up(n_real, 128), _round_up(n_block_max, 128))
    n_pad = _round_up(n_real, n_blk)
    grid = n_pad // n_blk
    n_extra = n_pad - n_real
    hT = pad_t(x, n_pad)

    layers = [(w1T, g1, be1), (w2T, g2, be2), (w3T, g3, be3)]
    scale = shift = None
    pad_val = None   # pre-BN value of the (constant) padded columns of hT
    for wT, gamma, beta in layers:
        hT, s, sq = _run_stream_stage(hT, wT, scale, shift,
                                      grid=grid, n_blk=n_blk,
                                      interm_dtype=intermediate_dtype)
        if n_extra > 0:
            if scale is None:
                # Stage 1: zero-padded input columns -> exact zero output cols.
                pad_val = jnp.zeros((wT.shape[0], 1), jnp.float32)
            else:
                # Subtract the known constant contribution of padded columns
                # (no in-kernel masking on the hot path).
                a_pad = jnp.maximum(pad_val * scale + shift, 0.0)
                pad_val = jnp.dot(wT, a_pad)
                s = s - n_extra * pad_val
                sq = sq - n_extra * pad_val * pad_val
        scale, shift = _bn_scale_shift(s, sq, gamma, beta, float(n_real))

    out = pl.pallas_call(
        _finalize_kernel,
        grid=(grid,),
        in_specs=[pl.BlockSpec((f3, n_blk), lambda i: (0, i)),
                  pl.BlockSpec((f3, 1), lambda i: (0, 0)),
                  pl.BlockSpec((f3, 1), lambda i: (0, 0))],
        out_specs=pl.BlockSpec((f3, n_blk), lambda i: (0, i)),
        out_shape=jax.ShapeDtypeStruct((f3, n_pad), jnp.float32),
        compiler_params=pltpu.CompilerParams(
            dimension_semantics=("parallel",),
            vmem_limit_bytes=_STREAM_VMEM_LIMIT),
    )(hT, scale, shift)
    return out[:, :n_real].T


# ---------------------------------------------------------------------------
# Parameters & pure-JAX reference (keeps biases -> proves BN cancels them)
# ---------------------------------------------------------------------------
def init_params(key, edge_feat_num, lin1_size, lin2_size, dim):
    ks = jax.random.split(key, 3)

    def linear(k, fan_in, fan_out):
        kw, kb = jax.random.split(k)
        bound = 1.0 / jnp.sqrt(float(fan_in))
        w = jax.random.uniform(kw, (fan_in, fan_out), jnp.float32, -bound, bound)
        b = jax.random.uniform(kb, (1, fan_out), jnp.float32, -bound, bound)
        return w, b

    w1, b1 = linear(ks[0], edge_feat_num, lin1_size)
    w2, b2 = linear(ks[1], lin1_size, lin2_size)
    w3, b3 = linear(ks[2], lin2_size, dim * dim)

    def bn(size):
        return jnp.ones((1, size), jnp.float32), jnp.zeros((1, size), jnp.float32)

    g1, be1 = bn(lin1_size)
    g2, be2 = bn(lin2_size)
    g3, be3 = bn(dim * dim)

    return dict(w1=w1, b1=b1, g1=g1, be1=be1,
                w2=w2, b2=b2, g2=g2, be2=be2,
                w3=w3, b3=b3, g3=g3, be3=be3)


def nn_reference(x, p):
    """Pure-JAX reference matching the PyTorch module (train-mode BN, biases)."""
    def bn(h, g, b):
        m = jnp.mean(h, axis=0, keepdims=True)
        v = jnp.mean((h - m) ** 2, axis=0, keepdims=True)
        return g * (h - m) / jnp.sqrt(v + BN_EPS) + b

    h = x @ p["w1"] + p["b1"]
    h = jnp.maximum(bn(h, p["g1"], p["be1"]), 0.0)
    h = h @ p["w2"] + p["b2"]
    h = jnp.maximum(bn(h, p["g2"], p["be2"]), 0.0)
    h = h @ p["w3"] + p["b3"]
    return bn(h, p["g3"], p["be3"])


if __name__ == "__main__":
    # Module-consistent shapes: edge_feat_num=4, lin1=32, lin2=32, dim=4 -> 16.
    N, EDGE_FEAT, LIN1, LIN2, DIM = 20, 4, 32, 32, 4

    key = jax.random.PRNGKey(0)
    kx, kx2, kp = jax.random.split(key, 3)
    params = init_params(kp, EDGE_FEAT, LIN1, LIN2, DIM)

    # 1) Small batch -> fused single-pallas_call fast path (with col masking).
    x = jax.random.normal(kx, (N, EDGE_FEAT), jnp.float32)
    ref = nn_reference(x, params)
    out = jax.block_until_ready(nn_forward(x, params))
    assert out.shape == (N, DIM * DIM)
    assert jnp.allclose(out, ref, atol=2e-4, rtol=2e-4), "fused path mismatch"

    # 2) Larger batch with fused path disabled -> multi-tile streaming path,
    #    exercising the wrapper-side padded-column statistics correction.
    N2 = 300
    x2 = jax.random.normal(kx2, (N2, EDGE_FEAT), jnp.float32)
    ref2 = nn_reference(x2, params)
    out2 = jax.block_until_ready(
        nn_forward(x2, params, n_block_max=128, max_fused_bytes=0))
    assert out2.shape == (N2, DIM * DIM)
    assert jnp.allclose(out2, ref2, atol=5e-4, rtol=5e-4), "streaming mismatch"

    # 3) Streaming path with bf16 intermediate activations (halves the dominant
    #    HBM traffic on v6e/v7x); stats/compute stay f32, tolerance is looser.
    out3 = jax.block_until_ready(
        nn_forward(x2, params, n_block_max=128, max_fused_bytes=0,
                   intermediate_dtype=jnp.bfloat16))
    assert jnp.allclose(out3, ref2, atol=1e-1, rtol=1e-1), "bf16 streaming mismatch"

    print("KERNEL_OK")
</pallas_src>

<mosaic_0001>
module attributes {stable_mosaic.version = 11 : i64} {
  func.func @kernel(%arg0: i32, %arg1: memref<4x128xf32, #tpu.memory_space<vmem>>, %arg2: memref<32x4xf32, #tpu.memory_space<vmem>>, %arg3: memref<32x32xf32, #tpu.memory_space<vmem>>, %arg4: memref<16x32xf32, #tpu.memory_space<vmem>>, %arg5: memref<32x1xf32, #tpu.memory_space<vmem>>, %arg6: memref<32x1xf32, #tpu.memory_space<vmem>>, %arg7: memref<32x1xf32, #tpu.memory_space<vmem>>, %arg8: memref<32x1xf32, #tpu.memory_space<vmem>>, %arg9: memref<16x1xf32, #tpu.memory_space<vmem>>, %arg10: memref<16x1xf32, #tpu.memory_space<vmem>>, %arg11: memref<16x128xf32, #tpu.memory_space<vmem>>) attributes {dimension_semantics = [#tpu.dimension_semantics<arbitrary>], iteration_bounds = array<i64: 1>, scalar_prefetch = 0 : i64, scratch_operands = 0 : i64, tpu.core_type = #tpu.core_type<tc>, window_params = [{pipeline_mode = #tpu.pipeline_mode<synchronous>, transform_indices = @transform_0, window_bounds = array<i64: 4, 128>}, {pipeline_mode = #tpu.pipeline_mode<synchronous>, transform_indices = @transform_1, window_bounds = array<i64: 32, 4>}, {pipeline_mode = #tpu.pipeline_mode<synchronous>, transform_indices = @transform_2, window_bounds = array<i64: 32, 32>}, {pipeline_mode = #tpu.pipeline_mode<synchronous>, transform_indices = @transform_3, window_bounds = array<i64: 16, 32>}, {pipeline_mode = #tpu.pipeline_mode<synchronous>, transform_indices = @transform_4, window_bounds = array<i64: 32, 1>}, {pipeline_mode = #tpu.pipeline_mode<synchronous>, transform_indices = @transform_5, window_bounds = array<i64: 32, 1>}, {pipeline_mode = #tpu.pipeline_mode<synchronous>, transform_indices = @transform_6, window_bounds = array<i64: 32, 1>}, {pipeline_mode = #tpu.pipeline_mode<synchronous>, transform_indices = @transform_7, window_bounds = array<i64: 32, 1>}, {pipeline_mode = #tpu.pipeline_mode<synchronous>, transform_indices = @transform_8, window_bounds = array<i64: 16, 1>}, {pipeline_mode = #tpu.pipeline_mode<synchronous>, transform_indices = @transform_9, window_bounds = array<i64: 16, 1>}, {pipeline_mode = #tpu.pipeline_mode<synchronous>, transform_indices = @transform_10, window_bounds = array<i64: 16, 128>}]} {
    %0 = tpu.iota {dimensions = array<i32: 1>} : vector<1x128xi32>
    %c20_i32 = arith.constant 20 : i32
    %1 = vector.broadcast %c20_i32 : i32 to vector<1x128xi32>
    %2 = arith.cmpi slt, %0, %1 : vector<1x128xi32>
    %3 = arith.extui %2 : vector<1x128xi1> to vector<1x128xi32>
    %4 = arith.sitofp %3 : vector<1x128xi32> to vector<1x128xf32>
    %c0 = arith.constant 0 : index
    %c0_0 = arith.constant 0 : index
    %5 = vector.load %arg1[%c0, %c0_0] : memref<4x128xf32, #tpu.memory_space<vmem>>, vector<4x128xf32>
    %c0_1 = arith.constant 0 : index
    %c0_2 = arith.constant 0 : index
    %6 = vector.load %arg2[%c0_1, %c0_2] : memref<32x4xf32, #tpu.memory_space<vmem>>, vector<32x4xf32>
    %cst = arith.constant dense<0.000000e+00> : vector<32x128xf32>
    %7 = tpu.matmul %6, %5, %cst {dimension_numbers = #tpu.dot_dimension_numbers<[1], [0], [0], [1], [0, 0, 1, 1], [], []>} : vector<32x4xf32>, vector<4x128xf32>, vector<32x128xf32> -> vector<32x128xf32>
    %c0_3 = arith.constant 0 : index
    %c0_4 = arith.constant 0 : index
    %8 = vector.load %arg5[%c0_3, %c0_4] : memref<32x1xf32, #tpu.memory_space<vmem>>, vector<32x1xf32>
    %c0_5 = arith.constant 0 : index
    %c0_6 = arith.constant 0 : index
    %9 = vector.load %arg6[%c0_5, %c0_6] : memref<32x1xf32, #tpu.memory_space<vmem>>, vector<32x1xf32>
    %cst_7 = arith.constant dense<0.000000e+00> : vector<32xf32>
    %10 = vector.multi_reduction <add>, %7, %cst_7 [1] : vector<32x128xf32> to vector<32xf32>
    %11 = vector.shape_cast %10 : vector<32xf32> to vector<32x1xf32>
    %cst_8 = arith.constant 5.000000e-02 : f32
    %12 = vector.broadcast %cst_8 : f32 to vector<32x1xf32>
    %13 = arith.mulf %11, %12 : vector<32x1xf32>
    %14 = arith.mulf %7, %7 : vector<32x128xf32>
    %cst_9 = arith.constant dense<0.000000e+00> : vector<32xf32>
    %15 = vector.multi_reduction <add>, %14, %cst_9 [1] : vector<32x128xf32> to vector<32xf32>
    %16 = vector.shape_cast %15 : vector<32xf32> to vector<32x1xf32>
    %cst_10 = arith.constant 5.000000e-02 : f32
    %17 = vector.broadcast %cst_10 : f32 to vector<32x1xf32>
    %18 = arith.mulf %16, %17 : vector<32x1xf32>
    %19 = arith.mulf %13, %13 : vector<32x1xf32>
    %20 = arith.subf %18, %19 : vector<32x1xf32>
    %cst_11 = arith.constant 0.000000e+00 : f32
    %21 = vector.broadcast %cst_11 : f32 to vector<32x1xf32>
    %22 = arith.maximumf %20, %21 : vector<32x1xf32>
    %cst_12 = arith.constant 9.99999974E-6 : f32
    %23 = vector.broadcast %cst_12 : f32 to vector<32x1xf32>
    %24 = arith.addf %22, %23 : vector<32x1xf32>
    %25 = math.rsqrt %24 : vector<32x1xf32>
    %26 = arith.mulf %8, %25 : vector<32x1xf32>
    %27 = arith.mulf %13, %26 : vector<32x1xf32>
    %28 = arith.subf %9, %27 : vector<32x1xf32>
    %29 = vector.broadcast %26 : vector<32x1xf32> to vector<32x128xf32>
    %30 = arith.mulf %7, %29 : vector<32x128xf32>
    %31 = vector.broadcast %28 : vector<32x1xf32> to vector<32x128xf32>
    %32 = arith.addf %30, %31 : vector<32x128xf32>
    %cst_13 = arith.constant 0.000000e+00 : f32
    %33 = vector.broadcast %cst_13 : f32 to vector<32x128xf32>
    %34 = arith.maximumf %32, %33 : vector<32x128xf32>
    %35 = vector.broadcast %4 : vector<1x128xf32> to vector<32x128xf32>
    %36 = arith.mulf %34, %35 : vector<32x128xf32>
    %c0_14 = arith.constant 0 : index
    %c0_15 = arith.constant 0 : index
    %37 = vector.load %arg3[%c0_14, %c0_15] : memref<32x32xf32, #tpu.memory_space<vmem>>, vector<32x32xf32>
    %cst_16 = arith.constant dense<0.000000e+00> : vector<32x128xf32>
    %38 = tpu.matmul %37, %36, %cst_16 {dimension_numbers = #tpu.dot_dimension_numbers<[1], [0], [0], [1], [0, 0, 1, 1], [], []>} : vector<32x32xf32>, vector<32x128xf32>, vector<32x128xf32> -> vector<32x128xf32>
    %c0_17 = arith.constant 0 : index
    %c0_18 = arith.constant 0 : index
    %39 = vector.load %arg7[%c0_17, %c0_18] : memref<32x1xf32, #tpu.memory_space<vmem>>, vector<32x1xf32>
    %c0_19 = arith.constant 0 : index
    %c0_20 = arith.constant 0 : index
    %40 = vector.load %arg8[%c0_19, %c0_20] : memref<32x1xf32, #tpu.memory_space<vmem>>, vector<32x1xf32>
    %cst_21 = arith.constant dense<0.000000e+00> : vector<32xf32>
    %41 = vector.multi_reduction <add>, %38, %cst_21 [1] : vector<32x128xf32> to vector<32xf32>
    %42 = vector.shape_cast %41 : vector<32xf32> to vector<32x1xf32>
    %cst_22 = arith.constant 5.000000e-02 : f32
    %43 = vector.broadcast %cst_22 : f32 to vector<32x1xf32>
    %44 = arith.mulf %42, %43 : vector<32x1xf32>
    %45 = arith.mulf %38, %38 : vector<32x128xf32>
    %cst_23 = arith.constant dense<0.000000e+00> : vector<32xf32>
    %46 = vector.multi_reduction <add>, %45, %cst_23 [1] : vector<32x128xf32> to vector<32xf32>
    %47 = vector.shape_cast %46 : vector<32xf32> to vector<32x1xf32>
    %cst_24 = arith.constant 5.000000e-02 : f32
    %48 = vector.broadcast %cst_24 : f32 to vector<32x1xf32>
    %49 = arith.mulf %47, %48 : vector<32x1xf32>
    %50 = arith.mulf %44, %44 : vector<32x1xf32>
    %51 = arith.subf %49, %50 : vector<32x1xf32>
    %cst_25 = arith.constant 0.000000e+00 : f32
    %52 = vector.broadcast %cst_25 : f32 to vector<32x1xf32>
    %53 = arith.maximumf %51, %52 : vector<32x1xf32>
    %cst_26 = arith.constant 9.99999974E-6 : f32
    %54 = vector.broadcast %cst_26 : f32 to vector<32x1xf32>
    %55 = arith.addf %53, %54 : vector<32x1xf32>
    %56 = math.rsqrt %55 : vector<32x1xf32>
    %57 = arith.mulf %39, %56 : vector<32x1xf32>
    %58 = arith.mulf %44, %57 : vector<32x1xf32>
    %59 = arith.subf %40, %58 : vector<32x1xf32>
    %60 = vector.broadcast %57 : vector<32x1xf32> to vector<32x128xf32>
    %61 = arith.mulf %38, %60 : vector<32x128xf32>
    %62 = vector.broadcast %59 : vector<32x1xf32> to vector<32x128xf32>
    %63 = arith.addf %61, %62 : vector<32x128xf32>
    %cst_27 = arith.constant 0.000000e+00 : f32
    %64 = vector.broadcast %cst_27 : f32 to vector<32x128xf32>
    %65 = arith.maximumf %63, %64 : vector<32x128xf32>
    %66 = vector.broadcast %4 : vector<1x128xf32> to vector<32x128xf32>
    %67 = arith.mulf %65, %66 : vector<32x128xf32>
    %c0_28 = arith.constant 0 : index
    %c0_29 = arith.constant 0 : index
    %68 = vector.load %arg4[%c0_28, %c0_29] : memref<16x32xf32, #tpu.memory_space<vmem>>, vector<16x32xf32>
    %cst_30 = arith.constant dense<0.000000e+00> : vector<16x128xf32>
    %69 = tpu.matmul %68, %67, %cst_30 {dimension_numbers = #tpu.dot_dimension_numbers<[1], [0], [0], [1], [0, 0, 1, 1], [], []>} : vector<16x32xf32>, vector<32x128xf32>, vector<16x128xf32> -> vector<16x128xf32>
    %c0_31 = arith.constant 0 : index
    %c0_32 = arith.constant 0 : index
    %70 = vector.load %arg9[%c0_31, %c0_32] : memref<16x1xf32, #tpu.memory_space<vmem>>, vector<16x1xf32>
    %c0_33 = arith.constant 0 : index
    %c0_34 = arith.constant 0 : index
    %71 = vector.load %arg10[%c0_33, %c0_34] : memref<16x1xf32, #tpu.memory_space<vmem>>, vector<16x1xf32>
    %cst_35 = arith.constant dense<0.000000e+00> : vector<16xf32>
    %72 = vector.multi_reduction <add>, %69, %cst_35 [1] : vector<16x128xf32> to vector<16xf32>
    %73 = vector.shape_cast %72 : vector<16xf32> to vector<16x1xf32>
    %cst_36 = arith.constant 5.000000e-02 : f32
    %74 = vector.broadcast %cst_36 : f32 to vector<16x1xf32>
    %75 = arith.mulf %73, %74 : vector<16x1xf32>
    %76 = arith.mulf %69, %69 : vector<16x128xf32>
    %cst_37 = arith.constant dense<0.000000e+00> : vector<16xf32>
    %77 = vector.multi_reduction <add>, %76, %cst_37 [1] : vector<16x128xf32> to vector<16xf32>
    %78 = vector.shape_cast %77 : vector<16xf32> to vector<16x1xf32>
    %cst_38 = arith.constant 5.000000e-02 : f32
    %79 = vector.broadcast %cst_38 : f32 to vector<16x1xf32>
    %80 = arith.mulf %78, %79 : vector<16x1xf32>
    %81 = arith.mulf %75, %75 : vector<16x1xf32>
    %82 = arith.subf %80, %81 : vector<16x1xf32>
    %cst_39 = arith.constant 0.000000e+00 : f32
    %83 = vector.broadcast %cst_39 : f32 to vector<16x1xf32>
    %84 = arith.maximumf %82, %83 : vector<16x1xf32>
    %cst_40 = arith.constant 9.99999974E-6 : f32
    %85 = vector.broadcast %cst_40 : f32 to vector<16x1xf32>
    %86 = arith.addf %84, %85 : vector<16x1xf32>
    %87 = math.rsqrt %86 : vector<16x1xf32>
    %88 = arith.mulf %70, %87 : vector<16x1xf32>
    %89 = arith.mulf %75, %88 : vector<16x1xf32>
    %90 = arith.subf %71, %89 : vector<16x1xf32>
    %91 = vector.broadcast %88 : vector<16x1xf32> to vector<16x128xf32>
    %92 = arith.mulf %69, %91 : vector<16x128xf32>
    %93 = vector.broadcast %90 : vector<16x1xf32> to vector<16x128xf32>
    %94 = arith.addf %92, %93 : vector<16x128xf32>
    %c0_41 = arith.constant 0 : index
    %c0_42 = arith.constant 0 : index
    %95 = vector.load %arg11[%c0_41, %c0_42] : memref<16x128xf32, #tpu.memory_space<vmem>>, vector<16x128xf32>
    tpu.vector_store %arg11[%c0_41, %c0_42], %94 {strides = array<i32>} : memref<16x128xf32, #tpu.memory_space<vmem>>, vector<16x128xf32>,
    return
  }
  func.func @transform_0(%arg0: i32) -> (i32, i32) {
    %c0_i32 = arith.constant 0 : i32
    %c0_i32_0 = arith.constant 0 : i32
    %c0_i32_1 = arith.constant 0 : i32
    return %c0_i32, %c0_i32_0 : i32, i32
  }
  func.func @transform_1(%arg0: i32) -> (i32, i32) {
    %c0_i32 = arith.constant 0 : i32
    %c0_i32_0 = arith.constant 0 : i32
    %c0_i32_1 = arith.constant 0 : i32
    return %c0_i32, %c0_i32_0 : i32, i32
  }
  func.func @transform_2(%arg0: i32) -> (i32, i32) {
    %c0_i32 = arith.constant 0 : i32
    %c0_i32_0 = arith.constant 0 : i32
    %c0_i32_1 = arith.constant 0 : i32
    return %c0_i32, %c0_i32_0 : i32, i32
  }
  func.func @transform_3(%arg0: i32) -> (i32, i32) {
    %c0_i32 = arith.constant 0 : i32
    %c0_i32_0 = arith.constant 0 : i32
    %c0_i32_1 = arith.constant 0 : i32
    return %c0_i32, %c0_i32_0 : i32, i32
  }
  func.func @transform_4(%arg0: i32) -> (i32, i32) {
    %c0_i32 = arith.constant 0 : i32
    %c0_i32_0 = arith.constant 0 : i32
    %c0_i32_1 = arith.constant 0 : i32
    return %c0_i32, %c0_i32_0 : i32, i32
  }
  func.func @transform_5(%arg0: i32) -> (i32, i32) {
    %c0_i32 = arith.constant 0 : i32
    %c0_i32_0 = arith.constant 0 : i32
    %c0_i32_1 = arith.constant 0 : i32
    return %c0_i32, %c0_i32_0 : i32, i32
  }
  func.func @transform_6(%arg0: i32) -> (i32, i32) {
    %c0_i32 = arith.constant 0 : i32
    %c0_i32_0 = arith.constant 0 : i32
    %c0_i32_1 = arith.constant 0 : i32
    return %c0_i32, %c0_i32_0 : i32, i32
  }
  func.func @transform_7(%arg0: i32) -> (i32, i32) {
    %c0_i32 = arith.constant 0 : i32
    %c0_i32_0 = arith.constant 0 : i32
    %c0_i32_1 = arith.constant 0 : i32
    return %c0_i32, %c0_i32_0 : i32, i32
  }
  func.func @transform_8(%arg0: i32) -> (i32, i32) {
    %c0_i32 = arith.constant 0 : i32
    %c0_i32_0 = arith.constant 0 : i32
    %c0_i32_1 = arith.constant 0 : i32
    return %c0_i32, %c0_i32_0 : i32, i32
  }
  func.func @transform_9(%arg0: i32) -> (i32, i32) {
    %c0_i32 = arith.constant 0 : i32
    %c0_i32_0 = arith.constant 0 : i32
    %c0_i32_1 = arith.constant 0 : i32
    return %c0_i32, %c0_i32_0 : i32, i32
  }
  func.func @transform_10(%arg0: i32) -> (i32, i32) {
    %c0_i32 = arith.constant 0 : i32
    %c0_i32_0 = arith.constant 0 : i32
    %c0_i32_1 = arith.constant 0 : i32
    return %c0_i32, %c0_i32_0 : i32, i32
  }
}

</mosaic_0001>

<bundles_post_ra>
// kernel: tpu_custom_call.1
= control target key start
LH: loop header
LB: loop body
LE: loop exit
PB: predicated region body
PF: predicated region fallthrough
CT: control target
= control target key end

     0   :  { %vm59_vm0 = vcmask 1043456   ;;  %vm46_vm1 = vcmask 31744   ;;  %s1017_s0 = inlined_call_operand.vmem [shape: f32[4,128], index: 0, kind: input, shape index: {}]   ;;  %s1018_s1 = inlined_call_operand.vmem [shape: f32[32,4], index: 1, kind: input, shape index: {}]   ;;  %s1019_s2 = inlined_call_operand.vmem [shape: f32[32,32], index: 2, kind: input, shape index: {}]   ;;  %s1020_s3 = inlined_call_operand.vmem [shape: f32[16,32], index: 3, kind: input, shape index: {}]   ;;  %s1021_s4 = inlined_call_operand.vmem [shape: f32[32,1], index: 4, kind: input, shape index: {}]   ;;  %s1022_s5 = inlined_call_operand.vmem [shape: f32[32,1], index: 5, kind: input, shape index: {}]   ;;  %s1023_s6 = inlined_call_operand.vmem [shape: f32[32,1], index: 6, kind: input, shape index: {}]   ;;  %s1024_s7 = inlined_call_operand.vmem [shape: f32[32,1], index: 7, kind: input, shape index: {}]   ;;  %s1025_s8 = inlined_call_operand.vmem [shape: f32[16,1], index: 8, kind: input, shape index: {}]   ;;  %s1026_s9 = inlined_call_operand.vmem [shape: f32[16,1], index: 9, kind: input, shape index: {}]   ;;  %s1027_s10 = inlined_call_operand.hbm [shape: f32[16,128], index: 10, kind: output, shape index: {}]  }
   0x1   :  { %v41_v0 = vld [vmem:[%s1017_s0] sm:$0xf]  ;;  %v43_v2 = vld [vmem:[%s1018_s1 + $0x8] sm:$0xff]  ;;  %v44_v3 = vld [vmem:[%s1018_s1 + $0x10] sm:$0xff] }
   0x2   :  { %v42_v1 = vld [vmem:[%s1018_s1] sm:$0xff]  ;;  %688 = vmatprep.subr.msk.mxu0 %vm59_vm0, %v41_v0 }
   0x3   :  { %690 = vmatprep.mubr.msk.f32.mxu0 %vm46_vm1, %v42_v1 }
   0x4   :  { %15 = vsyncpa [#allocation3], 0  ;;  %689 = vmatpush3.msk.msra.mxu0 %vm59_vm0, %v41_v0  ;;  %v45_v4 = vld [vmem:[%s1018_s1 + $0x18] sm:$0xff]  ;;  %v788_v13 = vmov 0   ;;  %v149_v44 = vld [vmem:[%s1021_s4 + $0x8] sm:$0xff]  ;;  %vm276_vm2 = vcmask 261120  }
   0x5   :  { %691 = vmatmul.mubr.msk.f32.vlgmr.msra.gmra.mrb[0].mxu0 %vm46_vm1, %v43_v2  ;;  %743 = vset.pattern.permute.xlu1 %v788_v13  ;;  %v153_v49 = vld [vmem:[%s1022_s5 + $0x8] sm:$0xff]  ;;  %v148_v50 = vld [vmem:[%s1021_s4] sm:$0xff]  ;;  %v151_v55 = vld [vmem:[%s1021_s4 + $0x18] sm:$0xff] }
   0x6   :  { %693 = vmatprep.mubr.msk.f32.mxu0 %vm46_vm1, %v44_v3  ;;  %742 = vset.pattern.permute.xlu0 %v788_v13  ;;  %v152_v60 = vld [vmem:[%s1022_s5] sm:$0xff]  ;;  %v150_v61 = vld [vmem:[%s1021_s4 + $0x10] sm:$0xff] }
   0x7   :  { %v154_v1 = vld [vmem:[%s1022_s5 + $0x10] sm:$0xff] }
   0x9   :  { %694 = vmatmul.mubr.msk.f32.gmra.mrb[2].mxu0 %vm46_vm1, %v45_v4  ;;  %v155_v4 = vld [vmem:[%s1022_s5 + $0x18] sm:$0xff] }
  0xd8   :  { %v863_v5 = vpop.f32.mrb[0].mxu0 }
  0xd9   :  { %158 = vadd.xlane.f32.xlu0 %v863_v5  ;;  %v866_v6 = vpop.f32.mrb[1].mxu0  ;;  %v169_v7 = vmul.f32 %v863_v5, %v863_v5 }
  0xda   :  { %v168_v9 = vmul.f32 %v866_v6, %v866_v6 }
  0xdb   :  { %174 = vadd.xlane.f32.xlu1 %v169_v7 }
  0xdc   :  { %v870_v8 = vpop.f32.mrb[2].mxu0 }
  0xdd   :  { %156 = vadd.xlane.f32.xlu0 %v866_v6  ;;  %v875_v10 = vpop.f32.mrb[3].mxu0  ;;  %v171_v12 = vmul.f32 %v870_v8, %v870_v8 }
  0xde   :  { %v170_v11 = vmul.f32 %v875_v10, %v875_v10 }
  0xdf   :  { %172 = vadd.xlane.f32.xlu1 %v168_v9  ;;  %v272_v9 = vld [vmem:[%s1019_s2] sm:$0xff] }
  0xe0   :  { %704 = vmatprep.mubr.msk.f32.mxu1 %vm276_vm2, %v272_v9 }
  0xe1   :  { %160 = vadd.xlane.f32.xlu0 %v875_v10 }
  0xe3   :  { %162 = vadd.xlane.f32.xlu1 %v870_v8 }
  0xe5   :  { %176 = vadd.xlane.f32.xlu0 %v170_v11 }
  0xe7   :  { %178 = vadd.xlane.f32.xlu1 %v171_v12  ;;  %v36_v12 = vlaneseq }
 0x166   :  { %v159_v14 = vpop.xlane.xlu0 %158 }
 0x167   :  { %v165_v15 = vmul.f32 0.05, %v159_v14 }
 0x168   :  { %v175_v16 = vpop.xlane.xlu1 %174 }
 0x169   :  { %v185_v17 = vmul.f32 %v165_v15, %v165_v15  ;;  %v181_v18 = vmul.f32 0.05, %v175_v16 }
 0x16a   :  { %v157_v19 = vpop.xlane.xlu0 %156 }
 0x16b   :  { %v189_v20 = vsub.f32 %v181_v18, %v185_v17  ;;  %v164_v21 = vmul.f32 0.05, %v157_v19 }
 0x16c   :  { %v173_v22 = vpop.xlane.xlu1 %172 }
 0x16d   :  { %v193_v23 = vmax.f32 %v189_v20, 0.0  ;;  %v184_v24 = vmul.f32 %v164_v21, %v164_v21  ;;  %v180_v25 = vmul.f32 0.05, %v173_v22 }
 0x16e   :  { %v161_v26 = vpop.xlane.xlu0 %160 }
 0x16f   :  { %v197_v27 = vadd.f32 1e-05, %v193_v23  ;;  %v188_v28 = vsub.f32 %v180_v25, %v184_v24  ;;  %v166_v29 = vmul.f32 0.05, %v161_v26  ;;  %v789_v23 = vmov 0.0  }
 0x170   :  { %v163_v30 = vpop.xlane.xlu1 %162 }
 0x171   :  { %744 = vrsqrt.f32 %v197_v27  ;;  %v192_v31 = vmax.f32 %v188_v28, 0.0  ;;  %v186_v32 = vmul.f32 %v166_v29, %v166_v29  ;;  %v167_v33 = vmul.f32 0.05, %v163_v30 }
 0x172   :  { %v177_v34 = vpop.xlane.xlu0 %176 }
 0x173   :  { %v196_v35 = vadd.f32 1e-05, %v192_v31  ;;  %v182_v36 = vmul.f32 0.05, %v177_v34  ;;  %v187_v38 = vmul.f32 %v167_v33, %v167_v33 }
 0x174   :  { %v179_v37 = vpop.xlane.xlu1 %178 }
 0x175   :  { %746 = vrsqrt.f32 %v196_v35  ;;  %v190_v39 = vsub.f32 %v182_v36, %v186_v32  ;;  %v183_v40 = vmul.f32 0.05, %v179_v37 }
 0x177   :  { %v194_v41 = vmax.f32 %v190_v39, 0.0  ;;  %v191_v42 = vsub.f32 %v183_v40, %v187_v38  ;;  %v274_v39 = vld [vmem:[%s1019_s2 + $0x10] sm:$0xff] }
 0x179   :  { %v195_v43 = vmax.f32 %v191_v42, 0.0  ;;  %v198_v46 = vadd.f32 1e-05, %v194_v41 }
 0x17b   :  { %v745_v45 = vpop.eup %744  ;;  %v199_v47 = vadd.f32 1e-05, %v195_v43 }
 0x17c   :  { %v205_v48 = vmul.f32 %v745_v45, %v149_v44 }
 0x17d   :  { %748 = vrsqrt.f32 %v199_v47 }
 0x17e   :  { %223 = vperm.xlu1 %743, %v205_v48   ;;  %v209_v51 = vmul.f32 %v205_v48, %v165_v15  ;;  %750 = vrsqrt.f32 %v198_v46  ;;  %v37_v15 = vand.u32 127, %v36_v12 }
 0x17f   :  { %v747_v52 = vpop.eup %746 }
 0x180   :  { %v213_v53 = vsub.f32 %v153_v49, %v209_v51  ;;  %v204_v54 = vmul.f32 %v747_v52, %v148_v50  ;;  %vm38_vm3 = vcmp.lt.s32.totalorder %v37_v15, 20 }
 0x181   :  { %v913_v24 = vsel %vm38_vm3, 1.0, %v789_v23 }
 0x182   :  { %247 = vperm.xlu1 %743, %v213_v53   ;;  %218 = vperm.xlu0 %742, %v204_v54   ;;  %v208_v58 = vmul.f32 %v204_v54, %v164_v21 }
 0x184   :  { %v212_v62 = vsub.f32 %v152_v60, %v208_v58 }
 0x187   :  { %v749_v56 = vpop.eup %748 }
 0x188   :  { %v207_v57 = vmul.f32 %v749_v56, %v151_v55  ;;  %v751_v59 = vpop.eup %750 }
 0x189   :  { %v206_v63 = vmul.f32 %v751_v59, %v150_v61 }
 0x18a   :  { %233 = vperm.xlu1 %743, %v207_v57   ;;  %v211_v3 = vmul.f32 %v207_v57, %v167_v33 }
 0x18b   :  { %v210_v0 = vmul.f32 %v206_v63, %v166_v29 }
 0x18c   :  { %v215_v7 = vsub.f32 %v155_v4, %v211_v3 }
 0x18d   :  { %v214_v2 = vsub.f32 %v154_v1, %v210_v0 }
 0x18e   :  { %242 = vperm.xlu1 %743, %v212_v62  }
 0x192   :  { %228 = vperm.xlu1 %743, %v206_v63  }
 0x196   :  { %252 = vperm.xlu1 %743, %v214_v2  }
 0x19a   :  { %257 = vperm.xlu1 %743, %v215_v7  }
 0x1fd   :  { %v224_v11 = vpop.permute.xlu1 %223 }
 0x1fe   :  { %v237_v14 = vmul.f32 %v863_v5, %v224_v11 }
 0x201   :  { %v248_v13 = vpop.permute.xlu1 %247  ;;  %v219_v16 = vpop.permute.xlu0 %218 }
 0x202   :  { %v261_v18 = vadd.f32 %v248_v13, %v237_v14  ;;  %v236_v19 = vmul.f32 %v219_v16, %v866_v6 }
 0x204   :  { %v265_v21 = vmax.f32 %v261_v18, 0.0 }
 0x206   :  { %v269_v27 = vmul.f32 %v913_v24, %v265_v21  ;;  %v375_v21 = vld [vmem:[%s1023_s6 + $0x8] sm:$0xff] }
 0x209   :  { %v234_v17 = vpop.permute.xlu1 %233 }
 0x20a   :  { %v239_v6 = vmul.f32 %v870_v8, %v234_v17  ;;  %v275_v8 = vld [vmem:[%s1019_s2 + $0x18] sm:$0xff] }
 0x20d   :  { %v243_v20 = vpop.permute.xlu1 %242 }
 0x20e   :  { %v260_v22 = vadd.f32 %v243_v20, %v236_v19  ;;  %v374_v20 = vld [vmem:[%s1023_s6] sm:$0xff] }
 0x210   :  { %v264_v25 = vmax.f32 %v260_v22, 0.0 }
 0x211   :  { %v229_v26 = vpop.permute.xlu1 %228 }
 0x212   :  { %v268_v28 = vmul.f32 %v913_v24, %v264_v25  ;;  %v238_v5 = vmul.f32 %v229_v26, %v875_v10  ;;  %v273_v10 = vld [vmem:[%s1019_s2 + $0x8] sm:$0xff] }
 0x214   :  { %v721_v29 = vpack.c.bf16 %v269_v27, %v268_v28  ;;  %v378_v27 = vld [vmem:[%s1024_s7] sm:$0xff] }
 0x215   :  { %v253_v30 = vpop.permute.xlu1 %252 }
 0x216   :  { %v262_v31 = vadd.f32 %v253_v30, %v238_v5  ;;  %722 = vmatprep.subr.bf16.mxu1 %v721_v29  ;;  %v379_v5 = vld [vmem:[%s1024_s7 + $0x8] sm:$0xff] }
 0x217   :  { %724 = vmatpush3.bf16.msra.mxu1 %v721_v29 }
 0x218   :  { %v266_v33 = vmax.f32 %v262_v31, 0.0 }
 0x219   :  { %v258_v32 = vpop.permute.xlu1 %257 }
 0x21a   :  { %v263_v34 = vadd.f32 %v258_v32, %v239_v6  ;;  %v270_v36 = vmul.f32 %v913_v24, %v266_v33  ;;  %v376_v6 = vld [vmem:[%s1023_s6 + $0x10] sm:$0xff]  ;;  %v377_v32 = vld [vmem:[%s1023_s6 + $0x18] sm:$0xff] }
 0x21c   :  { %v267_v35 = vmax.f32 %v263_v34, 0.0 }
 0x21e   :  { %v271_v37 = vmul.f32 %v913_v24, %v267_v35 }
 0x220   :  { %v725_v38 = vpack.c.bf16 %v271_v37, %v270_v36  ;;  %v380_v37 = vld [vmem:[%s1024_s7 + $0x10] sm:$0xff] }
 0x222   :  { %726 = vmatprep.subr.bf16.mxu1 %v725_v38 }
 0x223   :  { %728 = vmatpush3.bf16.msra.mxu1 %v725_v38  ;;  %v381_v38 = vld [vmem:[%s1024_s7 + $0x18] sm:$0xff] }
 0x226   :  { %705 = vmatmul.mubr.msk.f32.vlgmr.msra.gmra.mrb[0].mxu1 %vm276_vm2, %v273_v10 }
 0x227   :  { %707 = vmatprep.mubr.msk.f32.mxu1 %vm276_vm2, %v274_v39 }
 0x22a   :  { %708 = vmatmul.mubr.msk.f32.gmra.mrb[2].mxu1 %vm276_vm2, %v275_v8 }
 0x2f9   :  { %v933_v40 = vpop.f32.mrb[0].mxu1 }
 0x2fa   :  { %384 = vadd.xlane.f32.xlu0 %v933_v40  ;;  %v936_v41 = vpop.f32.mrb[1].mxu1  ;;  %v395_v43 = vmul.f32 %v933_v40, %v933_v40 }
 0x2fb   :  { %382 = vadd.xlane.f32.xlu1 %v936_v41  ;;  %v394_v42 = vmul.f32 %v936_v41, %v936_v41 }
 0x2fd   :  { %v943_v44 = vpop.f32.mrb[2].mxu1 }
 0x2fe   :  { %398 = vadd.xlane.f32.xlu0 %v394_v42  ;;  %v945_v45 = vpop.f32.mrb[3].mxu1  ;;  %v397_v47 = vmul.f32 %v943_v44, %v943_v44 }
 0x2ff   :  { %400 = vadd.xlane.f32.xlu1 %v395_v43  ;;  %v396_v46 = vmul.f32 %v945_v45, %v945_v45  ;;  %v498_v43 = vld [vmem:[%s1020_s3] sm:$0xff] }
 0x300   :  { %718 = vmatprep.mubr.msk.f32.mxu0 %vm276_vm2, %v498_v43 }
 0x302   :  { %386 = vadd.xlane.f32.xlu0 %v945_v45 }
 0x303   :  { %388 = vadd.xlane.f32.xlu1 %v943_v44 }
 0x306   :  { %402 = vadd.xlane.f32.xlu0 %v396_v46 }
 0x307   :  { %404 = vadd.xlane.f32.xlu1 %v397_v47 }
 0x387   :  { %v385_v48 = vpop.xlane.xlu0 %384 }
 0x388   :  { %v383_v49 = vpop.xlane.xlu1 %382  ;;  %v391_v50 = vmul.f32 0.05, %v385_v48 }
 0x389   :  { %v390_v51 = vmul.f32 0.05, %v383_v49 }
 0x38a   :  { %v411_v56 = vmul.f32 %v391_v50, %v391_v50 }
 0x38b   :  { %v410_v52 = vmul.f32 %v390_v51, %v390_v51  ;;  %v399_v53 = vpop.xlane.xlu0 %398 }
 0x38c   :  { %v406_v54 = vmul.f32 0.05, %v399_v53  ;;  %v401_v55 = vpop.xlane.xlu1 %400 }
 0x38d   :  { %v407_v57 = vmul.f32 0.05, %v401_v55 }
 0x38e   :  { %v414_v58 = vsub.f32 %v406_v54, %v410_v52 }
 0x38f   :  { %v415_v59 = vsub.f32 %v407_v57, %v411_v56  ;;  %v387_v60 = vpop.xlane.xlu0 %386 }
 0x390   :  { %v418_v61 = vmax.f32 %v414_v58, 0.0  ;;  %v392_v62 = vmul.f32 0.05, %v387_v60  ;;  %v389_v63 = vpop.xlane.xlu1 %388 }
 0x391   :  { %v419_v0 = vmax.f32 %v415_v59, 0.0  ;;  %v393_v1 = vmul.f32 0.05, %v389_v63 }
 0x392   :  { %v422_v2 = vadd.f32 1e-05, %v418_v61  ;;  %v412_v7 = vmul.f32 %v392_v62, %v392_v62 }
 0x393   :  { %v423_v3 = vadd.f32 1e-05, %v419_v0  ;;  %v403_v4 = vpop.xlane.xlu0 %402  ;;  %v413_v12 = vmul.f32 %v393_v1, %v393_v1 }
 0x394   :  { %752 = vrsqrt.f32 %v422_v2  ;;  %v408_v9 = vmul.f32 0.05, %v403_v4  ;;  %v405_v11 = vpop.xlane.xlu1 %404 }
 0x395   :  { %754 = vrsqrt.f32 %v423_v3  ;;  %v409_v13 = vmul.f32 0.05, %v405_v11 }
 0x396   :  { %v416_v14 = vsub.f32 %v408_v9, %v412_v7 }
 0x397   :  { %v417_v15 = vsub.f32 %v409_v13, %v413_v12 }
 0x398   :  { %v420_v16 = vmax.f32 %v416_v14, 0.0 }
 0x399   :  { %v421_v17 = vmax.f32 %v417_v15, 0.0 }
 0x39a   :  { %v424_v18 = vadd.f32 1e-05, %v420_v16 }
 0x39b   :  { %v425_v19 = vadd.f32 1e-05, %v421_v17 }
 0x39c   :  { %756 = vrsqrt.f32 %v424_v18 }
 0x39d   :  { %758 = vrsqrt.f32 %v425_v19 }
 0x39e   :  { %v753_v22 = vpop.eup %752 }
 0x39f   :  { %v755_v23 = vpop.eup %754  ;;  %v430_v25 = vmul.f32 %v753_v22, %v374_v20 }
 0x3a0   :  { %v431_v26 = vmul.f32 %v755_v23, %v375_v21 }
 0x3a1   :  { %444 = vperm.xlu0 %742, %v430_v25   ;;  %v434_v28 = vmul.f32 %v430_v25, %v390_v51 }
 0x3a2   :  { %449 = vperm.xlu1 %743, %v431_v26   ;;  %v435_v29 = vmul.f32 %v431_v26, %v391_v50 }
 0x3a3   :  { %v438_v30 = vsub.f32 %v378_v27, %v434_v28 }
 0x3a4   :  { %v439_v31 = vsub.f32 %v379_v5, %v435_v29  ;;  %v581_v5 = vld [vmem:[%s1025_s8] sm:$0xff]  ;;  %v582_v29 = vld [vmem:[%s1025_s8 + $0x8] sm:$0xff]  ;;  %s790_s8 = smov [#allocation2]  }
 0x3a5   :  { %s646_s2 = sshll.u32 %s790_s8, 4  ;;  %s647_s2 = int_to_ptr.vmem [resolvable:$true] %s646_s2 }
 0x3a6   :  { %v757_v33 = vpop.eup %756  ;;  %468 = vperm.xlu1 %743, %v438_v30   ;;  %473 = vperm.xlu0 %742, %v439_v31   ;;  %p769_p1 = scmp.lt.s32.totalorder %s647_s2, %s647_s2 }
 0x3a7   :  { %v759_v34 = vpop.eup %758  ;;  %v432_v35 = vmul.f32 %v757_v33, %v376_v6  ;;  %v583_v33 = vld [vmem:[%s1026_s9] sm:$0xff] }
 0x3a8   :  { %v433_v36 = vmul.f32 %v759_v34, %v377_v32  ;;  %v584_v34 = vld [vmem:[%s1026_s9 + $0x8] sm:$0xff]  ;;  %s764_s9 = scalar_lea.vmem %s647_s2, 256 }
 0x3a9   :  { %v436_v10 = vmul.f32 %v432_v35, %v392_v62  ;;  %p765_p0 = scmp.ne.s32.totalorder %s647_s2, %s764_s9  ;;  %p770_p2 = scmp.lt.s32.totalorder %s764_s9, %s764_s9 }
 0x3aa   :  { %459 = vperm.xlu0 %742, %v433_v36   ;;  %454 = vperm.xlu1 %743, %v432_v35   ;;  %v437_v39 = vmul.f32 %v433_v36, %v393_v1 }
 0x3ab   :  { %v440_v8 = vsub.f32 %v380_v37, %v436_v10  ;;  %p771_p3 = por %p770_p2, %p769_p1 }
 0x3ac   :  { %v441_v42 = vsub.f32 %v381_v38, %v437_v39 }
 0x3ad   :  { %p772_p4 = pnand %p771_p3, %p765_p0 }
 0x3ae   :  { %483 = vperm.xlu0 %742, %v441_v42   ;;  %478 = vperm.xlu1 %743, %v440_v8  }
 0x420   :  { %v445_v46 = vpop.permute.xlu0 %444 }
 0x421   :  { %v450_v47 = vpop.permute.xlu1 %449  ;;  %v462_v48 = vmul.f32 %v445_v46, %v936_v41 }
 0x422   :  { %v463_v49 = vmul.f32 %v933_v40, %v450_v47 }
 0x425   :  { %v469_v50 = vpop.permute.xlu1 %468  ;;  %v474_v51 = vpop.permute.xlu0 %473 }
 0x426   :  { %v486_v52 = vadd.f32 %v469_v50, %v462_v48  ;;  %v487_v53 = vadd.f32 %v474_v51, %v463_v49 }
 0x428   :  { %v490_v54 = vmax.f32 %v486_v52, 0.0  ;;  %v491_v55 = vmax.f32 %v487_v53, 0.0 }
 0x429   :  { %v455_v56 = vpop.permute.xlu1 %454  ;;  %v460_v57 = vpop.permute.xlu0 %459 }
 0x42a   :  { %v494_v58 = vmul.f32 %v913_v24, %v490_v54  ;;  %v495_v59 = vmul.f32 %v913_v24, %v491_v55  ;;  %v464_v60 = vmul.f32 %v455_v56, %v945_v45  ;;  %v465_v61 = vmul.f32 %v943_v44, %v460_v57  ;;  %v499_v44 = vld [vmem:[%s1020_s3 + $0x8] sm:$0xff] }
 0x42c   :  { %v729_v62 = vpack.c.bf16 %v495_v59, %v494_v58 }
 0x42d   :  { %v479_v41 = vpop.permute.xlu1 %478  ;;  %v484_v63 = vpop.permute.xlu0 %483 }
 0x42e   :  { %v488_v40 = vadd.f32 %v479_v41, %v464_v60  ;;  %v489_v0 = vadd.f32 %v484_v63, %v465_v61  ;;  %730 = vmatprep.subr.bf16.mxu0 %v729_v62 }
 0x42f   :  { %732 = vmatpush3.bf16.msra.mxu0 %v729_v62 }
 0x430   :  { %v492_v1 = vmax.f32 %v488_v40, 0.0  ;;  %v493_v2 = vmax.f32 %v489_v0, 0.0 }
 0x432   :  { %v496_v3 = vmul.f32 %v913_v24, %v492_v1  ;;  %v497_v4 = vmul.f32 %v913_v24, %v493_v2 }
 0x434   :  { %v733_v7 = vpack.c.bf16 %v497_v4, %v496_v3 }
 0x436   :  { %734 = vmatprep.subr.bf16.mxu0 %v733_v7 }
 0x437   :  { %736 = vmatpush3.bf16.msra.mxu0 %v733_v7 }
 0x43a   :  { %719 = vmatmul.mubr.msk.f32.vlgmr.msra.gmra.mrb[4].mxu0 %vm276_vm2, %v499_v44 }
 0x50d   :  { %v720_v45 = vpop.f32.mrb[4].mxu0 }
 0x50e   :  { %587 = vadd.xlane.f32.xlu0 %v720_v45  ;;  %v572_v9 = vpop.f32.mrb[5].mxu0  ;;  %v592_v12 = vmul.f32 %v720_v45, %v720_v45 }
 0x50f   :  { %585 = vadd.xlane.f32.xlu1 %v572_v9  ;;  %v591_v11 = vmul.f32 %v572_v9, %v572_v9 }
 0x512   :  { %593 = vadd.xlane.f32.xlu0 %v591_v11 }
 0x513   :  { %595 = vadd.xlane.f32.xlu1 %v592_v12 }
 0x59b   :  { %v588_v13 = vpop.xlane.xlu0 %587 }
 0x59c   :  { %v586_v14 = vpop.xlane.xlu1 %585  ;;  %v590_v24 = vmul.f32 0.05, %v588_v13 }
 0x59d   :  { %v589_v15 = vmul.f32 0.05, %v586_v14 }
 0x59e   :  { %v600_v20 = vmul.f32 %v590_v24, %v590_v24 }
 0x59f   :  { %v599_v16 = vmul.f32 %v589_v15, %v589_v15  ;;  %v594_v17 = vpop.xlane.xlu0 %593 }
 0x5a0   :  { %v597_v18 = vmul.f32 0.05, %v594_v17  ;;  %v596_v19 = vpop.xlane.xlu1 %595 }
 0x5a1   :  { %v598_v21 = vmul.f32 0.05, %v596_v19 }
 0x5a2   :  { %v601_v22 = vsub.f32 %v597_v18, %v599_v16 }
 0x5a3   :  { %v602_v23 = vsub.f32 %v598_v21, %v600_v20 }
 0x5a4   :  { %v603_v25 = vmax.f32 %v601_v22, 0.0 }
 0x5a5   :  { %v604_v26 = vmax.f32 %v602_v23, 0.0 }
 0x5a6   :  { %v605_v27 = vadd.f32 1e-05, %v603_v25 }
 0x5a7   :  { %v606_v28 = vadd.f32 1e-05, %v604_v26 }
 0x5a8   :  { %760 = vrsqrt.f32 %v605_v27 }
 0x5a9   :  { %762 = vrsqrt.f32 %v606_v28 }
 0x5b2   :  { %v761_v30 = vpop.eup %760 }
 0x5b3   :  { %v763_v31 = vpop.eup %762  ;;  %v609_v6 = vmul.f32 %v761_v30, %v581_v5 }
 0x5b4   :  { %v610_v32 = vmul.f32 %v763_v31, %v582_v29 }
 0x5b5   :  { %617 = vperm.xlu0 %742, %v609_v6   ;;  %v611_v35 = vmul.f32 %v609_v6, %v589_v15 }
 0x5b6   :  { %622 = vperm.xlu1 %743, %v610_v32   ;;  %v612_v36 = vmul.f32 %v610_v32, %v590_v24 }
 0x5b7   :  { %v613_v37 = vsub.f32 %v583_v33, %v611_v35 }
 0x5b8   :  { %v614_v38 = vsub.f32 %v584_v34, %v612_v36 }
 0x5ba   :  { %634 = vperm.xlu0 %742, %v614_v38   ;;  %629 = vperm.xlu1 %743, %v613_v37  }
 0x634   :  { %v618_v10 = vpop.permute.xlu0 %617 }
 0x635   :  { %v623_v39 = vpop.permute.xlu1 %622  ;;  %v625_v8 = vmul.f32 %v618_v10, %v572_v9 }
 0x636   :  { %v626_v42 = vmul.f32 %v720_v45, %v623_v39 }
 0x639   :  { %v635_v43 = vpop.permute.xlu0 %634  ;;  %v630_v46 = vpop.permute.xlu1 %629 }
 0x63a   :  { %v638_v47 = vadd.f32 %v635_v43, %v626_v42  ;;  %v637_v48 = vadd.f32 %v630_v46, %v625_v8 }
 0x63c   :  { %640 = vst [vmem:[#allocation2 + $0x8] sm:$0xff] %v638_v47  ;;  %639 = vst [vmem:[#allocation2] sm:$0xff] %v637_v48 }
 0x63d   :  { %775 = shalt.err (!%p772_p4)
}
 0x63e   :  { %s776_s23 = scalar_lea.hbm %s1027_s10, 256 }
 0x63f   :  { %p777_p5 = scmp.ne.s32.totalorder %s1027_s10, %s776_s23  ;;  %p780_p6 = scmp.lt.u32.totalorder %s776_s23, %s1027_s10 }
 0x641   :  { %p782_p7 = pnand %p780_p6, %p777_p5 }
 0x643   :  { %785 = shalt.err (!%p782_p7)
}
 0x644   :  { %s791_s28 = smov 128   ;;  %s792_s29 = smov 8  }
 0x645   :  { %652 = dma.vmem_to_hbm [thread:$0]  %s647_s2, 256, %s1027_s10, [#allocation3], %s791_s28, %s791_s28, %s792_s29  }
 0x646   :  { %786 = dma.done.wait [#allocation3], 256  }
 0x647   :  { %787 = vsyncadd [#allocation3], 4294967040 }
 0x648   :  { %656 = vsyncpa [#allocation3], 1 }

</bundles_post_ra>
